<compile_context>
chip_gen: v7x
topology: tpu7x:2x2x1
jax: 0.10.0
libtpu: 0.0.40
codegen_flags: <defaults>
</compile_context>

<pallas_src>
import jax
import jax.numpy as jnp
from jax import lax
from jax.experimental import pallas as pl
from jax.experimental.pallas import tpu as pltpu


# ---------------------------------------------------------------------------
# Activation (MBPO uses Swish).
# ---------------------------------------------------------------------------
def _swish_f32(x):
    # z * sigmoid(z) = z / (1 + exp(-z)).  exp lowers to the EUP slot, which
    # is idle during the matmul epilogue, so the activation is ~free.  Exact
    # reciprocal keeps the kernel within 1e-5 of the reference; approx=True
    # (EUP vrcp) is acceptable if ~1e-3 relative error is tolerable.
    return x * pl.reciprocal(1.0 + jnp.exp(-x), approx=False)


# ---------------------------------------------------------------------------
# Path 1: packed single-grid-step kernel (small ensembles, lane-dense output).
# ---------------------------------------------------------------------------
def _fc_packed_kernel(x_ref, w_ref, b_ref, o_ref):
    # x_ref: (B, E*I), w_ref: (E*I, E*O) block-diagonal, b_ref: (1, E*O),
    # o_ref: (B, E*O).  One MXU matmul + fused bias-add + Swish.
    acc = jnp.dot(x_ref[...], w_ref[...], preferred_element_type=jnp.float32)
    acc = acc + b_ref[...].astype(jnp.float32)        # (1, E*O) broadcast
    o_ref[...] = _swish_f32(acc).astype(o_ref.dtype)


def _fc_forward_packed(x, weight, bias):
    E, B, I = x.shape
    O = weight.shape[-1]
    out_dtype = x.dtype

    # Layout plumbing (tiny, wrapper-side): lane-dense packing of the ensemble.
    #   x      -> (B, E*I)
    #   weight -> block-diagonal (E*I, E*O)
    #   bias   -> (1, E*O)
    x_p = jnp.transpose(x, (1, 0, 2)).reshape(B, E * I)
    eye = jnp.eye(E, dtype=weight.dtype)
    w_bd = jnp.einsum("eio,ef->eifo", weight, eye).reshape(E * I, E * O)
    b_p = bias.reshape(1, E * O)

    itemsize = jnp.dtype(out_dtype).itemsize
    cost = pl.CostEstimate(
        # The block-diagonal matmul actually issued on the MXU:
        flops=2 * B * (E * I) * (E * O),
        transcendentals=B * E * O,
        bytes_accessed=(x_p.size + w_bd.size + b_p.size + B * E * O) * itemsize,
    )

    out_p = pl.pallas_call(
        _fc_packed_kernel,
        out_shape=jax.ShapeDtypeStruct((B, E * O), out_dtype),
        grid_spec=pltpu.PrefetchScalarGridSpec(
            num_scalar_prefetch=0,
            grid=(1,),  # single step: everything (a few tens of KiB) is resident
            in_specs=[
                pl.BlockSpec((B, E * I), lambda i: (0, 0)),
                pl.BlockSpec((E * I, E * O), lambda i: (0, 0)),
                pl.BlockSpec((1, E * O), lambda i: (0, 0)),
            ],
            out_specs=pl.BlockSpec((B, E * O), lambda i: (0, 0)),
        ),
        compiler_params=pltpu.CompilerParams(
            dimension_semantics=("arbitrary",),
        ),
        cost_estimate=cost,
    )(x_p, w_bd, b_p)

    # (B, E*O) -> (E, B, O)
    return jnp.transpose(out_p.reshape(B, E, O), (1, 0, 2))


# ---------------------------------------------------------------------------
# Path 2: general tm/tn/tk-tiled kernel with a resident f32 accumulator.
# ---------------------------------------------------------------------------
def _fc_tiled_kernel(x_ref, w_ref, b_ref, o_ref, acc_ref):
    # Blocks: x (1, tm, tk), w (1, tk, tn), b (1, 1, tn), o (1, tm, tn).
    k = pl.program_id(3)

    @pl.when(k == 0)
    def _init():
        acc_ref[...] = jnp.zeros_like(acc_ref)

    acc_ref[...] += jnp.dot(x_ref[0], w_ref[0],
                            preferred_element_type=jnp.float32)

    @pl.when(k == pl.num_programs(3) - 1)
    def _finalize():
        acc = acc_ref[...] + b_ref[0].astype(jnp.float32)   # (tm,tn)+(1,tn)
        o_ref[0] = _swish_f32(acc).astype(o_ref.dtype)


def _pick_tile(dim, pref, floor):
    """Largest tile <= pref that divides `dim` (halving down to `floor`),
    otherwise the full extent (always a legal Pallas block shape)."""
    if dim <= pref:
        return dim
    t = pref
    while t >= floor:
        if dim % t == 0:
            return t
        t //= 2
    return dim


def _fc_forward_tiled(x, weight, bias, *, tm=256, tn=256, tk=256):
    # tn/tk default to 256 to feed the 256x256 MXU on v6e/v7x (also fine on
    # v5e's 128-wide MXU); 2 inputs x 2 double-buffers + output + f32
    # accumulator stay well under the 32 MiB default scoped VMEM (and under
    # v7x's 64 MiB physical).  bf16 operands pass through unchanged and
    # accumulate in f32 via preferred_element_type.
    E, B, I = x.shape
    O = weight.shape[-1]
    out_dtype = x.dtype

    tm = _pick_tile(B, tm, 8)
    tn = _pick_tile(O, tn, 128)
    tk = _pick_tile(I, tk, 128)

    # Bias as (E, 1, O): block (1, 1, tn) has a well-formed second-to-last dim
    # (equal to the full extent, 1) and is fetched once per output tile.
    bias3 = bias.reshape(E, 1, O)

    itemsize = jnp.dtype(out_dtype).itemsize
    cost = pl.CostEstimate(
        flops=2 * E * B * I * O,
        transcendentals=E * B * O,
        bytes_accessed=(x.size + weight.size + bias.size + E * B * O) * itemsize,
    )

    grid = (E, B // tm, O // tn, I // tk)
    return pl.pallas_call(
        _fc_tiled_kernel,
        out_shape=jax.ShapeDtypeStruct((E, B, O), out_dtype),
        grid_spec=pltpu.PrefetchScalarGridSpec(
            num_scalar_prefetch=0,
            grid=grid,
            in_specs=[
                pl.BlockSpec((1, tm, tk), lambda e, i, j, k: (e, i, k)),
                pl.BlockSpec((1, tk, tn), lambda e, i, j, k: (e, k, j)),
                pl.BlockSpec((1, 1, tn), lambda e, i, j, k: (e, 0, j)),
            ],
            out_specs=pl.BlockSpec((1, tm, tn), lambda e, i, j, k: (e, i, j)),
            scratch_shapes=[pltpu.VMEM((tm, tn), jnp.float32)],
        ),
        compiler_params=pltpu.CompilerParams(
            dimension_semantics=("parallel", "parallel", "parallel", "arbitrary"),
        ),
        cost_estimate=cost,
    )(x, weight, bias3)


# ---------------------------------------------------------------------------
# Public wrapper: shape-based dispatch (static under jit).
# ---------------------------------------------------------------------------
# The block-diagonal weight is E x larger than the raw weight, so only take
# the packed single-step path when everything fits a few MiB of VMEM.
_PACKED_VMEM_BUDGET_BYTES = 4 * 1024 * 1024


@jax.jit
def fc_layer_forward(x, weight, bias):
    """Ensemble FC forward: swish(bmm(x, weight) + bias[:, None, :])."""
    E, B, I = x.shape
    O = weight.shape[-1]
    itemsize = jnp.dtype(x.dtype).itemsize
    packed_bytes = (B * E * I + (E * I) * (E * O) + E * O + B * E * O) * itemsize
    if packed_bytes <= _PACKED_VMEM_BUDGET_BYTES:
        return _fc_forward_packed(x, weight, bias)
    return _fc_forward_tiled(x, weight, bias)


def fc_layer_reference(x, weight, bias):
    """Pure-JAX reference mirroring the PyTorch forward (Swish activation)."""
    z = jnp.einsum("ebi,eio->ebo", x, weight,
                   precision=lax.Precision.HIGHEST) + bias[:, None, :]
    return z * jax.nn.sigmoid(z)


if __name__ == "__main__":
    key = jax.random.PRNGKey(0)
    k1, k2, k3, k4, k5, k6 = jax.random.split(key, 6)

    # --- Small MBPO-like shapes: exercises the packed, lane-dense path. ----
    E, B, I, O = 4, 8, 32, 32
    x = jax.random.normal(k1, (E, B, I), dtype=jnp.float32)
    w = jax.random.normal(k2, (E, I, O), dtype=jnp.float32) / jnp.sqrt(2.0 * I)
    b = jax.random.normal(k3, (E, O), dtype=jnp.float32) * 0.01

    out = jax.block_until_ready(fc_layer_forward(x, w, b))
    ref = fc_layer_reference(x, w, b)
    assert out.shape == (E, B, O) and out.dtype == x.dtype
    assert jnp.allclose(out, ref, atol=1e-5, rtol=1e-5), "packed path mismatch"

    # --- Medium shapes: exercises the tiled accumulator path (K loop). -----
    E2, B2, I2, O2 = 2, 256, 512, 384
    x2 = jax.random.normal(k4, (E2, B2, I2), dtype=jnp.float32)
    w2 = jax.random.normal(k5, (E2, I2, O2), dtype=jnp.float32) / jnp.sqrt(2.0 * I2)
    b2 = jax.random.normal(k6, (E2, O2), dtype=jnp.float32) * 0.01

    out2 = jax.block_until_ready(fc_layer_forward(x2, w2, b2))
    ref2 = fc_layer_reference(x2, w2, b2)
    assert out2.shape == (E2, B2, O2)
    assert jnp.allclose(out2, ref2, atol=1e-4, rtol=1e-4), "tiled path mismatch"

    print("KERNEL_OK")
</pallas_src>

<mosaic_0001>
module attributes {stable_mosaic.version = 11 : i64} {
  func.func @_fc_packed_kernel(%arg0: i32, %arg1: memref<8x128xf32, #tpu.memory_space<vmem>>, %arg2: memref<128x128xf32, #tpu.memory_space<vmem>>, %arg3: memref<1x128xf32, #tpu.memory_space<vmem>>, %arg4: memref<8x128xf32, #tpu.memory_space<vmem>>) attributes {dimension_semantics = [#tpu.dimension_semantics<arbitrary>], iteration_bounds = array<i64: 1>, scalar_prefetch = 0 : i64, scratch_operands = 0 : i64, tpu.core_type = #tpu.core_type<tc>, window_params = [{pipeline_mode = #tpu.pipeline_mode<synchronous>, transform_indices = @transform_0, window_bounds = array<i64: 8, 128>}, {pipeline_mode = #tpu.pipeline_mode<synchronous>, transform_indices = @transform_1, window_bounds = array<i64: 128, 128>}, {pipeline_mode = #tpu.pipeline_mode<synchronous>, transform_indices = @transform_2, window_bounds = array<i64: 1, 128>}, {pipeline_mode = #tpu.pipeline_mode<synchronous>, transform_indices = @transform_3, window_bounds = array<i64: 8, 128>}]} {
    %c0 = arith.constant 0 : index
    %c0_0 = arith.constant 0 : index
    %0 = vector.load %arg1[%c0, %c0_0] : memref<8x128xf32, #tpu.memory_space<vmem>>, vector<8x128xf32>
    %c0_1 = arith.constant 0 : index
    %c0_2 = arith.constant 0 : index
    %1 = vector.load %arg2[%c0_1, %c0_2] : memref<128x128xf32, #tpu.memory_space<vmem>>, vector<128x128xf32>
    %cst = arith.constant dense<0.000000e+00> : vector<8x128xf32>
    %2 = tpu.matmul %0, %1, %cst {dimension_numbers = #tpu.dot_dimension_numbers<[1], [0], [0], [1], [0, 0, 1, 1], [], []>} : vector<8x128xf32>, vector<128x128xf32>, vector<8x128xf32> -> vector<8x128xf32>
    %c0_3 = arith.constant 0 : index
    %c0_4 = arith.constant 0 : index
    %3 = vector.load %arg3[%c0_3, %c0_4] : memref<1x128xf32, #tpu.memory_space<vmem>>, vector<1x128xf32>
    %4 = vector.broadcast %3 : vector<1x128xf32> to vector<8x128xf32>
    %5 = arith.addf %2, %4 : vector<8x128xf32>
    %cst_5 = arith.constant 0.000000e+00 : f32
    %6 = vector.broadcast %cst_5 : f32 to vector<8x128xf32>
    %7 = arith.subf %6, %5 : vector<8x128xf32>
    %8 = math.exp %7 : vector<8x128xf32>
    %cst_6 = arith.constant 1.000000e+00 : f32
    %9 = vector.broadcast %cst_6 : f32 to vector<8x128xf32>
    %10 = arith.addf %9, %8 : vector<8x128xf32>
    %11 = tpu.reciprocal %10 : vector<8x128xf32> -> vector<8x128xf32>
    %12 = arith.mulf %5, %11 : vector<8x128xf32>
    %c0_7 = arith.constant 0 : index
    %c0_8 = arith.constant 0 : index
    %13 = vector.load %arg4[%c0_7, %c0_8] : memref<8x128xf32, #tpu.memory_space<vmem>>, vector<8x128xf32>
    tpu.vector_store %arg4[%c0_7, %c0_8], %12 {strides = array<i32>} : memref<8x128xf32, #tpu.memory_space<vmem>>, vector<8x128xf32>,
    return
  }
  func.func @transform_0(%arg0: i32) -> (i32, i32) {
    %c0_i32 = arith.constant 0 : i32
    %c0_i32_0 = arith.constant 0 : i32
    %c0_i32_1 = arith.constant 0 : i32
    return %c0_i32, %c0_i32_0 : i32, i32
  }
  func.func @transform_1(%arg0: i32) -> (i32, i32) {
    %c0_i32 = arith.constant 0 : i32
    %c0_i32_0 = arith.constant 0 : i32
    %c0_i32_1 = arith.constant 0 : i32
    return %c0_i32, %c0_i32_0 : i32, i32
  }
  func.func @transform_2(%arg0: i32) -> (i32, i32) {
    %c0_i32 = arith.constant 0 : i32
    %c0_i32_0 = arith.constant 0 : i32
    %c0_i32_1 = arith.constant 0 : i32
    return %c0_i32, %c0_i32_0 : i32, i32
  }
  func.func @transform_3(%arg0: i32) -> (i32, i32) {
    %c0_i32 = arith.constant 0 : i32
    %c0_i32_0 = arith.constant 0 : i32
    %c0_i32_1 = arith.constant 0 : i32
    return %c0_i32, %c0_i32_0 : i32, i32
  }
}

</mosaic_0001>

<bundles_post_ra>
// kernel: fc_layer_forward.1
= control target key start
LH: loop header
LB: loop body
LE: loop exit
PB: predicated region body
PF: predicated region fallthrough
CT: control target
= control target key end

     0   :  { %v203_v0 = vmov 0.0|0.0   ;;  %vm204_vm0 = vmmov 0   ;;  %v205_v4 = vmov 0.0   ;;  %s283_s1 = inlined_call_operand.vmem [shape: f32[128,128], index: 1, kind: input, shape index: {}]   ;;  %s284_s0 = inlined_call_operand.vmem [shape: f32[8,128], index: 0, kind: input, shape index: {}]   ;;  %s285_s2 = inlined_call_operand.vmem [shape: f32[1,128], index: 2, kind: input, shape index: {}]   ;;  %s286_s3 = inlined_call_operand.vmem [shape: f32[8,128], index: 3, kind: output, shape index: {}]  }
   0x1   :  { %172 = vmatprep.subr.bf16.mxu0 %v203_v0  ;;  %v15_v1 = vld [vmem:[%s283_s1] sm:$0xff]  ;;  %v16_v2 = vld [vmem:[%s283_s1 + $0x8] sm:$0xff]  ;;  %v17_v3 = vld [vmem:[%s283_s1 + $0x10] sm:$0xff]  ;;  %169 = vmatprep.mubr.msk.f32.mxu0 %vm204_vm0, %v205_v4 }
   0x2   :  { %v173_v5 = vpack.c.bf16 %v16_v2, %v15_v1  ;;  %v18_v6 = vld [vmem:[%s283_s1 + $0x18] sm:$0xff]  ;;  %v19_v8 = vld [vmem:[%s283_s1 + $0x20] sm:$0xff]  ;;  %v20_v9 = vld [vmem:[%s283_s1 + $0x28] sm:$0xff] }
   0x3   :  { %v176_v7 = vpack.c.bf16 %v18_v6, %v17_v3  ;;  %v179_v10 = vpack.c.bf16 %v20_v9, %v19_v8  ;;  %v21_v11 = vld [vmem:[%s283_s1 + $0x30] sm:$0xff]  ;;  %v22_v12 = vld [vmem:[%s283_s1 + $0x38] sm:$0xff]  ;;  %v23_v14 = vld [vmem:[%s283_s1 + $0x40] sm:$0xff] }
   0x4   :  { %174 = vmatpush3.bf16.msra.mxu0 %v173_v5  ;;  %v182_v13 = vpack.c.bf16 %v22_v12, %v21_v11  ;;  %v24_v15 = vld [vmem:[%s283_s1 + $0x48] sm:$0xff]  ;;  %v25_v17 = vld [vmem:[%s283_s1 + $0x50] sm:$0xff]  ;;  %v26_v18 = vld [vmem:[%s283_s1 + $0x58] sm:$0xff] }
   0x5   :  { %175 = vmatprep.subr.bf16.mxu0 %v203_v0  ;;  %v185_v16 = vpack.c.bf16 %v24_v15, %v23_v14  ;;  %v188_v19 = vpack.c.bf16 %v26_v18, %v25_v17  ;;  %v27_v20 = vld [vmem:[%s283_s1 + $0x60] sm:$0xff]  ;;  %v28_v21 = vld [vmem:[%s283_s1 + $0x68] sm:$0xff]  ;;  %v29_v23 = vld [vmem:[%s283_s1 + $0x70] sm:$0xff] }
   0x6   :  { %v191_v22 = vpack.c.bf16 %v28_v21, %v27_v20  ;;  %v30_v24 = vld [vmem:[%s283_s1 + $0x78] sm:$0xff]  ;;  %v14_v26 = vld [vmem:[%s284_s0] sm:$0xff] }
   0x7   :  { %v194_v25 = vpack.c.bf16 %v30_v24, %v29_v23  ;;  %v119_v27 = vld [vmem:[%s285_s2] ss:$0 sm:$0xff] }
   0x8   :  { %177 = vmatpush3.bf16.msra.mxu0 %v176_v7 }
   0x9   :  { %178 = vmatprep.subr.bf16.mxu0 %v203_v0 }
   0xc   :  { %180 = vmatpush3.bf16.msra.mxu0 %v179_v10 }
   0xd   :  { %181 = vmatprep.subr.bf16.mxu0 %v203_v0 }
  0x10   :  { %183 = vmatpush3.bf16.msra.mxu0 %v182_v13 }
  0x11   :  { %184 = vmatprep.subr.bf16.mxu0 %v203_v0 }
  0x14   :  { %186 = vmatpush3.bf16.msra.mxu0 %v185_v16 }
  0x15   :  { %187 = vmatprep.subr.bf16.mxu0 %v203_v0 }
  0x18   :  { %189 = vmatpush3.bf16.msra.mxu0 %v188_v19 }
  0x19   :  { %190 = vmatprep.subr.bf16.mxu0 %v203_v0 }
  0x1c   :  { %192 = vmatpush3.bf16.msra.mxu0 %v191_v22 }
  0x1d   :  { %193 = vmatprep.subr.bf16.mxu0 %v203_v0 }
  0x20   :  { %195 = vmatpush3.bf16.msra.mxu0 %v194_v25 }
  0x23   :  { %170 = vmatmul.mubr.f32.vlgmr.msra.gmra.mrb[0].mxu0 %v14_v26 }
  0xf6   :  { %v104_v28 = vpop.f32.mrb[0].mxu0 }
  0xf7   :  { %v105_v29 = vadd.f32 %v119_v27, %v104_v28  ;;  %v171_v30 = vpop.f32.mrb[1].mxu0 }
  0xf9   :  { %v108_v31 = vsub.f32 0.0, %v105_v29 }
  0xfb   :  { %v109_v32 = vmul.f32 1.442695, %v108_v31 }
  0xfd   :  { %199 = vpow2.f32 %v109_v32 }
 0x107   :  { %v200_v33 = vpop.eup %199 }
 0x108   :  { %v111_v34 = vadd.f32 1.0, %v200_v33 }
 0x10a   :  { %201 = vrcp.f32 %v111_v34 }
 0x114   :  { %v202_v35 = vpop.eup %201 }
 0x115   :  { %v113_v36 = vmul.f32 %v202_v35, %v105_v29 }
 0x117   :  { %114 = vst [vmem:[%s286_s3] sm:$0xff] %v113_v36 }

</bundles_post_ra>
